<compile_context>
chip_gen: v7x
topology: tpu7x:2x2x1
jax: 0.10.0
libtpu: 0.0.40
codegen_flags: <defaults>
</compile_context>

<pallas_src>
import jax
import jax.numpy as jnp
from jax import lax
from jax.experimental import pallas as pl
from jax.experimental.pallas import tpu as pltpu


def _out_size(n, k, s):
    return (n - k) // s + 1


# ------------------------------ fused kernel -------------------------------- #

def _gather_rows(h, start, num, stride):
    """Rows start, start+stride, ..., start+stride*(num-1) of a 2-D value."""
    if stride == 1:
        return h[start:start + num, :]
    # Strided row gather as a tiny 0/1 selection matmul (robust on the MXU;
    # avoids strided sublane slices).  Exact: one nonzero per row.
    hin = h.shape[0]
    col = lax.broadcasted_iota(jnp.int32, (num, hin), 1)
    want = start + stride * lax.broadcasted_iota(jnp.int32, (num, hin), 0)
    sel = (col == want).astype(h.dtype)                       # (num, Hin)
    return jnp.dot(sel, h, preferred_element_type=jnp.float32).astype(h.dtype)


def _make_fused_kernel(layer_cfgs):
    """layer_cfgs: tuple of (K, stride, Ho, Wo, Cout) per conv layer."""
    n_layers = len(layer_cfgs)

    def kernel(*refs):
        x_ref = refs[0]
        o_ref = refs[1 + 2 * n_layers]
        h = x_ref[0]                                          # (Hin, Win*Cin) bf16
        for idx, (k, s, ho, wo, cout) in enumerate(layer_cfgs):
            w_ref = refs[1 + 2 * idx]                         # (K, Win*Cin, Wo*Cout) bf16
            b_ref = refs[2 + 2 * idx]                         # (1, Wo*Cout) f32
            acc = jnp.zeros((ho, wo * cout), jnp.float32)
            for kh in range(k):                               # K row-shifted matmuls
                rows = _gather_rows(h, kh, ho, s)             # (Ho, Win*Cin)
                acc = acc + jnp.dot(rows, w_ref[kh],
                                    preferred_element_type=jnp.float32)
            act = jnp.maximum(acc + b_ref[...], 0.0)          # f32 bias + ReLU epilogue
            h = act.astype(jnp.bfloat16) if idx + 1 < n_layers else act
        o_ref[0] = h                                          # (Ho_last, Wo_last*Cout_last) f32

    return kernel


# --------------------------- wrapper / weight prep --------------------------- #

def _band_weight(w_oihw, w_in, stride):
    """Fold kw taps + horizontal stride into a block-banded matmul weight.

    Returns (K, Win*Cin, Wo*Cout) with
      band[kh, w*Cin + ci, wo*Cout + co] = w[co, ci, kh, w - stride*wo]  (0 <= kw < K)
    so that   y[ho, wo*Cout + co] = sum_kh  x_rows(kh)[ho] @ band[kh]   is the conv.
    """
    cout, cin, k, _ = w_oihw.shape
    wo = _out_size(w_in, k, stride)
    w_idx = jnp.arange(w_in)[:, None, None]
    wo_idx = jnp.arange(wo)[None, :, None]
    kw_idx = jnp.arange(k)[None, None, :]
    sel = (w_idx == stride * wo_idx + kw_idx).astype(w_oihw.dtype)   # (Win, Wo, K)
    band = jnp.einsum('avk,oimk->maivo', sel, w_oihw)                # (K, Win, Cin, Wo, Cout)
    return band.reshape(k, w_in * cin, wo * cout)


def kcnn_forward(x_nchw, params):
    """Fused conv-stack forward.  x: (B, Cin, H, W) f32;  params: [(w, b, stride)]."""
    b_sz, cin0, h0, w0 = x_nchw.shape

    # Only wrapper glue on the input: NCHW -> NHWC -> (B, H, W*Cin) bf16.
    x2d = jnp.transpose(x_nchw, (0, 2, 3, 1)).reshape(b_sz, h0, w0 * cin0)
    x2d = x2d.astype(jnp.bfloat16)

    layer_cfgs = []
    operands = []
    hin, win, cin = h0, w0, cin0
    flops = 0
    for (w, b, s) in params:
        cout, _, k, _ = w.shape
        ho, wo = _out_size(hin, k, s), _out_size(win, k, s)
        operands.append(_band_weight(w, win, s).astype(jnp.bfloat16))
        operands.append(jnp.tile(b, wo).reshape(1, wo * cout).astype(jnp.float32))
        layer_cfgs.append((k, s, ho, wo, cout))
        flops += 2 * b_sz * k * ho * (win * cin) * (wo * cout)
        hin, win, cin = ho, wo, cout
    ho_f, wo_f, cout_f = hin, win, cin

    in_specs = [pl.BlockSpec((1, h0, w0 * cin0), lambda i: (i, 0, 0))]
    for op in operands:
        if op.ndim == 3:   # band weights stay VMEM-resident across the grid
            in_specs.append(pl.BlockSpec(op.shape, lambda i: (0, 0, 0)))
        else:              # f32 bias rows
            in_specs.append(pl.BlockSpec(op.shape, lambda i: (0, 0)))

    bytes_accessed = int(x2d.size * 2
                         + sum(op.size * op.dtype.itemsize for op in operands)
                         + b_sz * ho_f * wo_f * cout_f * 4)

    out = pl.pallas_call(
        _make_fused_kernel(tuple(layer_cfgs)),
        out_shape=jax.ShapeDtypeStruct((b_sz, ho_f, wo_f * cout_f), jnp.float32),
        grid=(b_sz,),
        in_specs=in_specs,
        out_specs=pl.BlockSpec((1, ho_f, wo_f * cout_f), lambda i: (i, 0, 0)),
        compiler_params=pltpu.CompilerParams(dimension_semantics=("parallel",)),
        cost_estimate=pl.CostEstimate(flops=flops, transcendentals=0,
                                      bytes_accessed=bytes_accessed),
    )(x2d, *operands)

    # nn.Flatten() on the NCHW activation => channel-major (c, h, w) ordering.
    out = out.reshape(b_sz, ho_f, wo_f, cout_f)
    out = jnp.transpose(out, (0, 3, 1, 2)).reshape(b_sz, -1)
    return out


# ------------------------------- parameters ---------------------------------- #

def init_kcnn_params(key, in_channels, conv_layers):
    """Deterministic PyTorch-like (uniform +/- 1/sqrt(fan_in)) init."""
    params = []
    c_in = in_channels
    for (c_out, k, s) in conv_layers:
        key, k1, k2 = jax.random.split(key, 3)
        fan_in = c_in * k * k
        bound = 1.0 / float(fan_in) ** 0.5
        w = jax.random.uniform(k1, (c_out, c_in, k, k), jnp.float32, -bound, bound)
        b = jax.random.uniform(k2, (c_out,), jnp.float32, -bound, bound)
        params.append((w, b, s))
        c_in = c_out
    return params


# ----------------------------------- main ------------------------------------ #

if __name__ == "__main__":
    key = jax.random.PRNGKey(0)

    img_size = (16, 16)
    in_channels = 4
    batch = 2
    conv_layers = [(8, 3, 1), (16, 3, 2)]          # (out_channels, kernel, stride)

    key, kx = jax.random.split(key)
    x = jax.random.normal(kx, (batch, in_channels, *img_size), jnp.float32)
    params = init_kcnn_params(key, in_channels, conv_layers)

    fwd = jax.jit(lambda xx: kcnn_forward(xx, params))
    out = jax.block_until_ready(fwd(x))

    # Reference: XLA convs with identical bf16 operand rounding, f32 accumulation,
    # f32 bias + ReLU epilogue, and bf16 re-rounding of intermediate activations.
    ref = x
    for (w, b, s) in params:
        xb = ref.astype(jnp.bfloat16).astype(jnp.float32)
        wb = w.astype(jnp.bfloat16).astype(jnp.float32)
        y = lax.conv_general_dilated(
            xb, wb, (s, s), "VALID",
            dimension_numbers=("NCHW", "OIHW", "NCHW"),
            precision=lax.Precision.HIGHEST)
        ref = jax.nn.relu(y + b[None, :, None, None])
    ref = ref.reshape(ref.shape[0], -1)

    assert out.shape == ref.shape, (out.shape, ref.shape)
    max_err = float(jnp.max(jnp.abs(out - ref)))
    assert jnp.allclose(out, ref, atol=2e-3, rtol=2e-3), max_err

    print("KERNEL_OK")
</pallas_src>

<mosaic_0001>
module attributes {stable_mosaic.version = 11 : i64} {
  func.func @kernel(%arg0: i32, %arg1: memref<1x16x64xbf16, #tpu.memory_space<vmem>>, %arg2: memref<3x64x112xbf16, #tpu.memory_space<vmem>>, %arg3: memref<1x112xf32, #tpu.memory_space<vmem>>, %arg4: memref<3x112x96xbf16, #tpu.memory_space<vmem>>, %arg5: memref<1x96xf32, #tpu.memory_space<vmem>>, %arg6: memref<1x6x96xf32, #tpu.memory_space<vmem>>) attributes {dimension_semantics = [#tpu.dimension_semantics<parallel>], iteration_bounds = array<i64: 2>, scalar_prefetch = 0 : i64, scratch_operands = 0 : i64, tpu.core_type = #tpu.core_type<tc>, window_params = [{transform_indices = @transform_0, window_bounds = array<i64: 1, 16, 64>}, {pipeline_mode = #tpu.pipeline_mode<synchronous>, transform_indices = @transform_1, window_bounds = array<i64: 3, 64, 112>}, {pipeline_mode = #tpu.pipeline_mode<synchronous>, transform_indices = @transform_2, window_bounds = array<i64: 1, 112>}, {pipeline_mode = #tpu.pipeline_mode<synchronous>, transform_indices = @transform_3, window_bounds = array<i64: 3, 112, 96>}, {pipeline_mode = #tpu.pipeline_mode<synchronous>, transform_indices = @transform_4, window_bounds = array<i64: 1, 96>}, {transform_indices = @transform_5, window_bounds = array<i64: 1, 6, 96>}]} {
    %c0 = arith.constant 0 : index
    %c0_0 = arith.constant 0 : index
    %c0_1 = arith.constant 0 : index
    %0 = vector.load %arg1[%c0, %c0_0, %c0_1] : memref<1x16x64xbf16, #tpu.memory_space<vmem>>, vector<1x16x64xbf16>
    %1 = vector.shape_cast %0 : vector<1x16x64xbf16> to vector<16x64xbf16>
    %cst = arith.constant 0.000000e+00 : f32
    %2 = vector.broadcast %cst : f32 to vector<14x112xf32>
    %3 = vector.extract_strided_slice %1 {offsets = [0, 0], sizes = [14, 64], strides = [1, 1]} : vector<16x64xbf16> to vector<14x64xbf16>
    %c0_2 = arith.constant 0 : index
    %c0_3 = arith.constant 0 : index
    %c0_4 = arith.constant 0 : index
    %4 = vector.load %arg2[%c0_2, %c0_3, %c0_4] : memref<3x64x112xbf16, #tpu.memory_space<vmem>>, vector<1x64x112xbf16>
    %5 = vector.shape_cast %4 : vector<1x64x112xbf16> to vector<64x112xbf16>
    %cst_5 = arith.constant dense<0.000000e+00> : vector<14x112xf32>
    %6 = tpu.matmul %3, %5, %cst_5 {dimension_numbers = #tpu.dot_dimension_numbers<[1], [0], [0], [1], [0, 0, 1, 1], [], []>} : vector<14x64xbf16>, vector<64x112xbf16>, vector<14x112xf32> -> vector<14x112xf32>
    %7 = arith.addf %2, %6 : vector<14x112xf32>
    %8 = vector.extract_strided_slice %1 {offsets = [1, 0], sizes = [14, 64], strides = [1, 1]} : vector<16x64xbf16> to vector<14x64xbf16>
    %c1 = arith.constant 1 : index
    %c0_6 = arith.constant 0 : index
    %c0_7 = arith.constant 0 : index
    %9 = vector.load %arg2[%c1, %c0_6, %c0_7] : memref<3x64x112xbf16, #tpu.memory_space<vmem>>, vector<1x64x112xbf16>
    %10 = vector.shape_cast %9 : vector<1x64x112xbf16> to vector<64x112xbf16>
    %cst_8 = arith.constant dense<0.000000e+00> : vector<14x112xf32>
    %11 = tpu.matmul %8, %10, %cst_8 {dimension_numbers = #tpu.dot_dimension_numbers<[1], [0], [0], [1], [0, 0, 1, 1], [], []>} : vector<14x64xbf16>, vector<64x112xbf16>, vector<14x112xf32> -> vector<14x112xf32>
    %12 = arith.addf %7, %11 : vector<14x112xf32>
    %13 = vector.extract_strided_slice %1 {offsets = [2, 0], sizes = [14, 64], strides = [1, 1]} : vector<16x64xbf16> to vector<14x64xbf16>
    %c2 = arith.constant 2 : index
    %c0_9 = arith.constant 0 : index
    %c0_10 = arith.constant 0 : index
    %14 = vector.load %arg2[%c2, %c0_9, %c0_10] : memref<3x64x112xbf16, #tpu.memory_space<vmem>>, vector<1x64x112xbf16>
    %15 = vector.shape_cast %14 : vector<1x64x112xbf16> to vector<64x112xbf16>
    %cst_11 = arith.constant dense<0.000000e+00> : vector<14x112xf32>
    %16 = tpu.matmul %13, %15, %cst_11 {dimension_numbers = #tpu.dot_dimension_numbers<[1], [0], [0], [1], [0, 0, 1, 1], [], []>} : vector<14x64xbf16>, vector<64x112xbf16>, vector<14x112xf32> -> vector<14x112xf32>
    %17 = arith.addf %12, %16 : vector<14x112xf32>
    %c0_12 = arith.constant 0 : index
    %c0_13 = arith.constant 0 : index
    %18 = vector.load %arg3[%c0_12, %c0_13] : memref<1x112xf32, #tpu.memory_space<vmem>>, vector<1x112xf32>
    %19 = vector.broadcast %18 : vector<1x112xf32> to vector<14x112xf32>
    %20 = arith.addf %17, %19 : vector<14x112xf32>
    %cst_14 = arith.constant 0.000000e+00 : f32
    %21 = vector.broadcast %cst_14 : f32 to vector<14x112xf32>
    %22 = arith.maximumf %20, %21 : vector<14x112xf32>
    %23 = arith.truncf %22 : vector<14x112xf32> to vector<14x112xbf16>
    %cst_15 = arith.constant 0.000000e+00 : f32
    %24 = vector.broadcast %cst_15 : f32 to vector<6x96xf32>
    %25 = tpu.iota {dimensions = array<i32: 1>} : vector<6x14xi32>
    %26 = tpu.iota {dimensions = array<i32: 0>} : vector<6x14xi32>
    %c2_i32 = arith.constant 2 : i32
    %27 = vector.broadcast %c2_i32 : i32 to vector<6x14xi32>
    %28 = arith.muli %27, %26 : vector<6x14xi32>
    %c0_i32 = arith.constant 0 : i32
    %29 = vector.broadcast %c0_i32 : i32 to vector<6x14xi32>
    %30 = arith.addi %29, %28 : vector<6x14xi32>
    %31 = arith.cmpi eq, %25, %30 : vector<6x14xi32>
    %32 = arith.extui %31 : vector<6x14xi1> to vector<6x14xi32>
    %33 = arith.sitofp %32 : vector<6x14xi32> to vector<6x14xf32>
    %34 = arith.truncf %33 : vector<6x14xf32> to vector<6x14xbf16>
    %cst_16 = arith.constant dense<0.000000e+00> : vector<6x112xf32>
    %35 = tpu.matmul %34, %23, %cst_16 {dimension_numbers = #tpu.dot_dimension_numbers<[1], [0], [0], [1], [0, 0, 1, 1], [], []>} : vector<6x14xbf16>, vector<14x112xbf16>, vector<6x112xf32> -> vector<6x112xf32>
    %36 = arith.truncf %35 : vector<6x112xf32> to vector<6x112xbf16>
    %c0_17 = arith.constant 0 : index
    %c0_18 = arith.constant 0 : index
    %c0_19 = arith.constant 0 : index
    %37 = vector.load %arg4[%c0_17, %c0_18, %c0_19] : memref<3x112x96xbf16, #tpu.memory_space<vmem>>, vector<1x112x96xbf16>
    %38 = vector.shape_cast %37 : vector<1x112x96xbf16> to vector<112x96xbf16>
    %cst_20 = arith.constant dense<0.000000e+00> : vector<6x96xf32>
    %39 = tpu.matmul %36, %38, %cst_20 {dimension_numbers = #tpu.dot_dimension_numbers<[1], [0], [0], [1], [0, 0, 1, 1], [], []>} : vector<6x112xbf16>, vector<112x96xbf16>, vector<6x96xf32> -> vector<6x96xf32>
    %40 = arith.addf %24, %39 : vector<6x96xf32>
    %41 = tpu.iota {dimensions = array<i32: 1>} : vector<6x14xi32>
    %42 = tpu.iota {dimensions = array<i32: 0>} : vector<6x14xi32>
    %c2_i32_21 = arith.constant 2 : i32
    %43 = vector.broadcast %c2_i32_21 : i32 to vector<6x14xi32>
    %44 = arith.muli %43, %42 : vector<6x14xi32>
    %c1_i32 = arith.constant 1 : i32
    %45 = vector.broadcast %c1_i32 : i32 to vector<6x14xi32>
    %46 = arith.addi %45, %44 : vector<6x14xi32>
    %47 = arith.cmpi eq, %41, %46 : vector<6x14xi32>
    %48 = arith.extui %47 : vector<6x14xi1> to vector<6x14xi32>
    %49 = arith.sitofp %48 : vector<6x14xi32> to vector<6x14xf32>
    %50 = arith.truncf %49 : vector<6x14xf32> to vector<6x14xbf16>
    %cst_22 = arith.constant dense<0.000000e+00> : vector<6x112xf32>
    %51 = tpu.matmul %50, %23, %cst_22 {dimension_numbers = #tpu.dot_dimension_numbers<[1], [0], [0], [1], [0, 0, 1, 1], [], []>} : vector<6x14xbf16>, vector<14x112xbf16>, vector<6x112xf32> -> vector<6x112xf32>
    %52 = arith.truncf %51 : vector<6x112xf32> to vector<6x112xbf16>
    %c1_23 = arith.constant 1 : index
    %c0_24 = arith.constant 0 : index
    %c0_25 = arith.constant 0 : index
    %53 = vector.load %arg4[%c1_23, %c0_24, %c0_25] : memref<3x112x96xbf16, #tpu.memory_space<vmem>>, vector<1x112x96xbf16>
    %54 = vector.shape_cast %53 : vector<1x112x96xbf16> to vector<112x96xbf16>
    %cst_26 = arith.constant dense<0.000000e+00> : vector<6x96xf32>
    %55 = tpu.matmul %52, %54, %cst_26 {dimension_numbers = #tpu.dot_dimension_numbers<[1], [0], [0], [1], [0, 0, 1, 1], [], []>} : vector<6x112xbf16>, vector<112x96xbf16>, vector<6x96xf32> -> vector<6x96xf32>
    %56 = arith.addf %40, %55 : vector<6x96xf32>
    %57 = tpu.iota {dimensions = array<i32: 1>} : vector<6x14xi32>
    %58 = tpu.iota {dimensions = array<i32: 0>} : vector<6x14xi32>
    %c2_i32_27 = arith.constant 2 : i32
    %59 = vector.broadcast %c2_i32_27 : i32 to vector<6x14xi32>
    %60 = arith.muli %59, %58 : vector<6x14xi32>
    %c2_i32_28 = arith.constant 2 : i32
    %61 = vector.broadcast %c2_i32_28 : i32 to vector<6x14xi32>
    %62 = arith.addi %61, %60 : vector<6x14xi32>
    %63 = arith.cmpi eq, %57, %62 : vector<6x14xi32>
    %64 = arith.extui %63 : vector<6x14xi1> to vector<6x14xi32>
    %65 = arith.sitofp %64 : vector<6x14xi32> to vector<6x14xf32>
    %66 = arith.truncf %65 : vector<6x14xf32> to vector<6x14xbf16>
    %cst_29 = arith.constant dense<0.000000e+00> : vector<6x112xf32>
    %67 = tpu.matmul %66, %23, %cst_29 {dimension_numbers = #tpu.dot_dimension_numbers<[1], [0], [0], [1], [0, 0, 1, 1], [], []>} : vector<6x14xbf16>, vector<14x112xbf16>, vector<6x112xf32> -> vector<6x112xf32>
    %68 = arith.truncf %67 : vector<6x112xf32> to vector<6x112xbf16>
    %c2_30 = arith.constant 2 : index
    %c0_31 = arith.constant 0 : index
    %c0_32 = arith.constant 0 : index
    %69 = vector.load %arg4[%c2_30, %c0_31, %c0_32] : memref<3x112x96xbf16, #tpu.memory_space<vmem>>, vector<1x112x96xbf16>
    %70 = vector.shape_cast %69 : vector<1x112x96xbf16> to vector<112x96xbf16>
    %cst_33 = arith.constant dense<0.000000e+00> : vector<6x96xf32>
    %71 = tpu.matmul %68, %70, %cst_33 {dimension_numbers = #tpu.dot_dimension_numbers<[1], [0], [0], [1], [0, 0, 1, 1], [], []>} : vector<6x112xbf16>, vector<112x96xbf16>, vector<6x96xf32> -> vector<6x96xf32>
    %72 = arith.addf %56, %71 : vector<6x96xf32>
    %c0_34 = arith.constant 0 : index
    %c0_35 = arith.constant 0 : index
    %73 = vector.load %arg5[%c0_34, %c0_35] : memref<1x96xf32, #tpu.memory_space<vmem>>, vector<1x96xf32>
    %74 = vector.broadcast %73 : vector<1x96xf32> to vector<6x96xf32>
    %75 = arith.addf %72, %74 : vector<6x96xf32>
    %cst_36 = arith.constant 0.000000e+00 : f32
    %76 = vector.broadcast %cst_36 : f32 to vector<6x96xf32>
    %77 = arith.maximumf %75, %76 : vector<6x96xf32>
    %c0_37 = arith.constant 0 : index
    %c0_38 = arith.constant 0 : index
    %c0_39 = arith.constant 0 : index
    %78 = vector.load %arg6[%c0_37, %c0_38, %c0_39] : memref<1x6x96xf32, #tpu.memory_space<vmem>>, vector<1x6x96xf32>
    %79 = vector.shape_cast %78 : vector<1x6x96xf32> to vector<6x96xf32>
    %80 = vector.shape_cast %77 : vector<6x96xf32> to vector<1x6x96xf32>
    tpu.vector_store %arg6[%c0_37, %c0_38, %c0_39], %80 {strides = array<i32>} : memref<1x6x96xf32, #tpu.memory_space<vmem>>, vector<1x6x96xf32>,
    return
  }
  func.func @transform_0(%arg0: i32) -> (i32, i32, i32) {
    %c0_i32 = arith.constant 0 : i32
    %c0_i32_0 = arith.constant 0 : i32
    %c0_i32_1 = arith.constant 0 : i32
    return %arg0, %c0_i32, %c0_i32_0 : i32, i32, i32
  }
  func.func @transform_1(%arg0: i32) -> (i32, i32, i32) {
    %c0_i32 = arith.constant 0 : i32
    %c0_i32_0 = arith.constant 0 : i32
    %c0_i32_1 = arith.constant 0 : i32
    %c0_i32_2 = arith.constant 0 : i32
    return %c0_i32, %c0_i32_0, %c0_i32_1 : i32, i32, i32
  }
  func.func @transform_2(%arg0: i32) -> (i32, i32) {
    %c0_i32 = arith.constant 0 : i32
    %c0_i32_0 = arith.constant 0 : i32
    %c0_i32_1 = arith.constant 0 : i32
    return %c0_i32, %c0_i32_0 : i32, i32
  }
  func.func @transform_3(%arg0: i32) -> (i32, i32, i32) {
    %c0_i32 = arith.constant 0 : i32
    %c0_i32_0 = arith.constant 0 : i32
    %c0_i32_1 = arith.constant 0 : i32
    %c0_i32_2 = arith.constant 0 : i32
    return %c0_i32, %c0_i32_0, %c0_i32_1 : i32, i32, i32
  }
  func.func @transform_4(%arg0: i32) -> (i32, i32) {
    %c0_i32 = arith.constant 0 : i32
    %c0_i32_0 = arith.constant 0 : i32
    %c0_i32_1 = arith.constant 0 : i32
    return %c0_i32, %c0_i32_0 : i32, i32
  }
  func.func @transform_5(%arg0: i32) -> (i32, i32, i32) {
    %c0_i32 = arith.constant 0 : i32
    %c0_i32_0 = arith.constant 0 : i32
    %c0_i32_1 = arith.constant 0 : i32
    return %arg0, %c0_i32, %c0_i32_0 : i32, i32, i32
  }
}

</mosaic_0001>

<bundles_post_ra>
// kernel: tile.10
= control target key start
LH: loop header
LB: loop body
LE: loop exit
PB: predicated region body
PF: predicated region fallthrough
CT: control target
= control target key end

     0   :  { %s28_s0 = inlined_call_operand.vmem [shape: f32[8], index: 0, kind: input, shape index: {}]   ;;  %s29_s1 = inlined_call_operand.vmem [shape: f32[14,8], index: 1, kind: output, shape index: {}]  }
   0x1   :  { %v4_v0 = vld [vmem:[%s28_s0] ss:$0 sm:$0xff] }
   0x2   :  { %5 = vst [vmem:[%s29_s1] sm:$0xff] %v4_v0  ;;  %8 = vst [vmem:[%s29_s1 + $0x8] sm:$0xff] %v4_v0 }

// kernel: tile.11
= control target key start
LH: loop header
LB: loop body
LE: loop exit
PB: predicated region body
PF: predicated region fallthrough
CT: control target
= control target key end

     0   :  { %s115_s10 = smov 104   ;;  %s116_s11 = smov 88   ;;  %vm3_vm0 = vcmask 64512   ;;  %vm9_vm1 = vcmask 917312   ;;  %vm15_vm2 = vcmask 851712   ;;  %vm21_vm3 = vcmask 786112   ;;  %s183_s0 = inlined_call_operand.vmem [shape: f32[14,8], index: 0, kind: input, shape index: {}]   ;;  %s184_s1 = inlined_call_operand.vmem [shape: f32[1,112], index: 1, kind: output, shape index: {}]  }
   0x1   :  { %v89_v0 = vld [vmem:[%s183_s0 + $0xd] sm:$0x1]   ;;  %v91_v1 = vld [vmem:[%s183_s0 + $0xb] sm:$0x1]   ;;  %v90_v2 = vld [vmem:[%s183_s0 + $0xc] sm:$0x1]  }
   0x2   :  { %7 = vrot.lane.b32.xlu0 %v89_v0, %s115_s10  ;;  %19 = vrot.lane.b32.xlu1 %v91_v1, %s116_s11  ;;  %v92_v3 = vld [vmem:[%s183_s0 + $0xa] sm:$0x1]   ;;  %s117_s16 = smov 96   ;;  %s118_s17 = smov 80   ;;  %v93_v4 = vld [vmem:[%s183_s0 + $0x9] sm:$0x1]  }
   0x3   :  { %v94_v5 = vld [vmem:[%s183_s0 + $0x8] sm:$0x1]   ;;  %v2_v6 = vld [vmem:[%s183_s0] sm:$0x1]   ;;  %s119_s24 = smov 72   ;;  %s120_s25 = smov 64  }
   0x4   :  { %4 = vst.msk [vmem:[#allocation0] sm:$0x1] %vm3_vm0, %v2_v6   ;;  %v95_v7 = vld [vmem:[%s183_s0 + $0x7] sm:$0x1]   ;;  %v96_v8 = vld [vmem:[%s183_s0 + $0x6] sm:$0x1]  }
   0x5   :  { %s121_s30 = smov 56   ;;  %s122_s2 = smov 48   ;;  %v97_v9 = vld [vmem:[%s183_s0 + $0x5] sm:$0x1]   ;;  %v98_v10 = vld [vmem:[%s183_s0 + $0x4] sm:$0x1]  }
   0x6   :  { %13 = vrot.lane.b32.xlu0 %v90_v2, %s117_s16  ;;  %25 = vrot.lane.b32.xlu1 %v92_v3, %s118_s17  ;;  %s123_s7 = smov 40   ;;  %s124_s8 = smov 32   ;;  %v99_v11 = vld [vmem:[%s183_s0 + $0x3] sm:$0x1]   ;;  %v100_v12 = vld [vmem:[%s183_s0 + $0x2] sm:$0x1]  }
   0x7   :  { %s125_s13 = smov 24   ;;  %s126_s14 = smov 16   ;;  %v101_v13 = vld [vmem:[%s183_s0 + $0x1] sm:$0x1]   ;;  %vm27_vm4 = vcmask 720512   ;;  %vm33_vm5 = vcmask 654912  }
   0x8   :  { %s127_s0 = smov 8   ;;  %vm39_vm6 = vcmask 589312   ;;  %vm45_vm7 = vcmask 523712   ;;  %vm51_vm8 = vcmask 458112   ;;  %vm57_vm9 = vcmask 392512  }
   0x9   :  { %vm63_vm10 = vcmask 326912   ;;  %vm69_vm11 = vcmask 261312   ;;  %vm75_vm12 = vcmask 195712   ;;  %vm81_vm13 = vcmask 130112  }
   0xa   :  { %31 = vrot.lane.b32.xlu0 %v93_v4, %s119_s24  ;;  %37 = vrot.lane.b32.xlu1 %v94_v5, %s120_s25 }
   0xe   :  { %43 = vrot.lane.b32.xlu0 %v95_v7, %s121_s30  ;;  %49 = vrot.lane.b32.xlu1 %v96_v8, %s122_s2 }
  0x12   :  { %55 = vrot.lane.b32.xlu0 %v97_v9, %s123_s7  ;;  %61 = vrot.lane.b32.xlu1 %v98_v10, %s124_s8 }
  0x16   :  { %67 = vrot.lane.b32.xlu0 %v99_v11, %s125_s13  ;;  %73 = vrot.lane.b32.xlu1 %v100_v12, %s126_s14 }
  0x1a   :  { %79 = vrot.lane.b32.xlu0 %v101_v13, %s127_s0 }
  0x74   :  { %v8_v14 = vpop.permute.xlu0 %7   ;;  %v20_v15 = vpop.permute.xlu1 %19  }
  0x75   :  { %10 = vst.msk [vmem:[#allocation0] sm:$0x1] %vm9_vm1, %v8_v14  }
  0x78   :  { %v14_v16 = vpop.permute.xlu0 %13   ;;  %v26_v17 = vpop.permute.xlu1 %25  }
  0x79   :  { %16 = vst.msk [vmem:[#allocation0] sm:$0x1] %vm15_vm2, %v14_v16  }
  0x7a   :  { %22 = vst.msk [vmem:[#allocation0] sm:$0x1] %vm21_vm3, %v20_v15  }
  0x7b   :  { %28 = vst.msk [vmem:[#allocation0] sm:$0x1] %vm27_vm4, %v26_v17  }
  0x7c   :  { %v32_v18 = vpop.permute.xlu0 %31   ;;  %v38_v19 = vpop.permute.xlu1 %37  }
  0x7d   :  { %34 = vst.msk [vmem:[#allocation0] sm:$0x1] %vm33_vm5, %v32_v18  }
  0x7e   :  { %40 = vst.msk [vmem:[#allocation0] sm:$0x1] %vm39_vm6, %v38_v19  }
  0x80   :  { %v44_v20 = vpop.permute.xlu0 %43   ;;  %v50_v21 = vpop.permute.xlu1 %49  }
  0x81   :  { %46 = vst.msk [vmem:[#allocation0] sm:$0x1] %vm45_vm7, %v44_v20  }
  0x82   :  { %52 = vst.msk [vmem:[#allocation0] sm:$0x1] %vm51_vm8, %v50_v21  }
  0x84   :  { %v56_v22 = vpop.permute.xlu0 %55   ;;  %v62_v23 = vpop.permute.xlu1 %61  }
  0x85   :  { %58 = vst.msk [vmem:[#allocation0] sm:$0x1] %vm57_vm9, %v56_v22  }
  0x86   :  { %64 = vst.msk [vmem:[#allocation0] sm:$0x1] %vm63_vm10, %v62_v23  }
  0x88   :  { %v68_v24 = vpop.permute.xlu0 %67   ;;  %v74_v25 = vpop.permute.xlu1 %73  }
  0x89   :  { %70 = vst.msk [vmem:[#allocation0] sm:$0x1] %vm69_vm11, %v68_v24  }
  0x8a   :  { %76 = vst.msk [vmem:[#allocation0] sm:$0x1] %vm75_vm12, %v74_v25  }
  0x8c   :  { %v80_v26 = vpop.permute.xlu0 %79  }
  0x8d   :  { %82 = vst.msk [vmem:[#allocation0] sm:$0x1] %vm81_vm13, %v80_v26  }
  0x94   :  { %v86_v27 = vld [vmem:[#allocation0] sm:$0x1] }
  0x95   :  { %88 = vst [vmem:[%s184_s1] sm:$0x1] %v86_v27 }

// kernel: tile.14
= control target key start
LH: loop header
LB: loop body
LE: loop exit
PB: predicated region body
PF: predicated region fallthrough
CT: control target
= control target key end

     0   :  { %s22_s0 = inlined_call_operand.vmem [shape: f32[16], index: 0, kind: input, shape index: {}]   ;;  %s23_s1 = inlined_call_operand.vmem [shape: f32[6,16], index: 1, kind: output, shape index: {}]  }
   0x1   :  { %v4_v0 = vld [vmem:[%s22_s0] ss:$0 sm:$0xff] }
   0x2   :  { %5 = vst [vmem:[%s23_s1] sm:$0xff] %v4_v0 }

// kernel: tile.15
= control target key start
LH: loop header
LB: loop body
LE: loop exit
PB: predicated region body
PF: predicated region fallthrough
CT: control target
= control target key end

     0   :  { %s51_s10 = smov 80   ;;  %s52_s11 = smov 48   ;;  %vm3_vm0 = vcmask 130048   ;;  %vm9_vm1 = vcmask 786048   ;;  %vm15_vm2 = vcmask 654848   ;;  %vm21_vm3 = vcmask 523648   ;;  %s87_s0 = inlined_call_operand.vmem [shape: f32[6,16], index: 0, kind: input, shape index: {}]   ;;  %s88_s1 = inlined_call_operand.vmem [shape: f32[1,96], index: 1, kind: output, shape index: {}]  }
   0x1   :  { %v41_v0 = vld [vmem:[%s87_s0 + $0x5] sm:$0x1]   ;;  %v43_v1 = vld [vmem:[%s87_s0 + $0x3] sm:$0x1]   ;;  %v42_v2 = vld [vmem:[%s87_s0 + $0x4] sm:$0x1]  }
   0x2   :  { %7 = vrot.lane.b32.xlu0 %v41_v0, %s51_s10  ;;  %19 = vrot.lane.b32.xlu1 %v43_v1, %s52_s11  ;;  %v44_v3 = vld [vmem:[%s87_s0 + $0x2] sm:$0x1]   ;;  %v2_v4 = vld [vmem:[%s87_s0] sm:$0x1]   ;;  %s53_s18 = smov 64   ;;  %s54_s19 = smov 32  }
   0x3   :  { %4 = vst.msk [vmem:[#allocation0] sm:$0x1] %vm3_vm0, %v2_v4   ;;  %v45_v5 = vld [vmem:[%s87_s0 + $0x1] sm:$0x1]   ;;  %s55_s0 = smov 16   ;;  %vm27_vm4 = vcmask 392448  }
   0x4   :  { %vm33_vm5 = vcmask 261248  }
   0x6   :  { %13 = vrot.lane.b32.xlu0 %v42_v2, %s53_s18  ;;  %25 = vrot.lane.b32.xlu1 %v44_v3, %s54_s19 }
   0xa   :  { %31 = vrot.lane.b32.xlu0 %v45_v5, %s55_s0 }
  0x74   :  { %v8_v6 = vpop.permute.xlu0 %7   ;;  %v20_v7 = vpop.permute.xlu1 %19  }
  0x75   :  { %10 = vst.msk [vmem:[#allocation0] sm:$0x1] %vm9_vm1, %v8_v6  }
  0x78   :  { %v14_v8 = vpop.permute.xlu0 %13   ;;  %v26_v9 = vpop.permute.xlu1 %25  }
  0x79   :  { %16 = vst.msk [vmem:[#allocation0] sm:$0x1] %vm15_vm2, %v14_v8  }
  0x7a   :  { %22 = vst.msk [vmem:[#allocation0] sm:$0x1] %vm21_vm3, %v20_v7  }
  0x7b   :  { %28 = vst.msk [vmem:[#allocation0] sm:$0x1] %vm27_vm4, %v26_v9  }
  0x7c   :  { %v32_v10 = vpop.permute.xlu0 %31  }
  0x7d   :  { %34 = vst.msk [vmem:[#allocation0] sm:$0x1] %vm33_vm5, %v32_v10  }
  0x84   :  { %v38_v11 = vld [vmem:[#allocation0] sm:$0x1] }
  0x85   :  { %40 = vst [vmem:[%s88_s1] sm:$0x1] %v38_v11 }

// kernel: _lambda_.1
= control target key start
LH: loop header
LB: loop body
LE: loop exit
PB: predicated region body
PF: predicated region fallthrough
CT: control target
= control target key end

     0   :  { %s1344_s18 = smov 0   ;;  %s1554_s0 = inlined_call_operand.vmem [shape: bf16[2,16,64], index: 0, kind: input, shape index: {}]   ;;  %s1555_s1 = inlined_call_operand.vmem [shape: bf16[3,64,112], index: 1, kind: input, shape index: {}]   ;;  %s1556_s2 = inlined_call_operand.vmem [shape: f32[1,112], index: 2, kind: input, shape index: {}]   ;;  %s1557_s3 = inlined_call_operand.vmem [shape: bf16[3,112,96], index: 3, kind: input, shape index: {}]   ;;  %s1558_s4 = inlined_call_operand.vmem [shape: f32[1,96], index: 4, kind: input, shape index: {}]   ;;  %s1559_s5 = inlined_call_operand.vmem [shape: f32[2,6,96], index: 5, kind: output, shape index: {}]  }
   0x1 LB: > { %s1004_s19 = sadd.s32 4294967295, %s1310_s18   ;;  %p1008_p0 = scmp.ge.s32.totalorder %s1310_s18, 1  ;;  %s1310_s18 = sphi %s1344_s18, %s15_s18  }
   0x2   : > { %p187_p1 = scmp.lt.s32.totalorder %s1310_s18, 3 }
   0x4   : > { %p188_p2 = pnand %p1008_p0, %p187_p1 }
   0x5   : > { %v1270_v0 = vld [vmem:[%s1555_s1 + $0x20] sm:$0xff] (!%p188_p2)   ;;  %v1312_v1 = vmov (!%p188_p2), 0.0   ;;  %v1272_v3 = vld [vmem:[%s1555_s1 + $0x28] sm:$0xff] (!%p188_p2)   ;;  %vm1313_vm0 = vmmov (!%p188_p2), 0   ;;  %p214_p3 = scmp.lt.s32.totalorder (!%p188_p2), %s1004_s19, 1  ;;  %v1274_v5 = vld [vmem:[%s1555_s1 + $0x30] sm:$0xff] (!%p188_p2)   ;;  %v483_v29 = vlaneseq (!%p188_p2) }
   0x6   : > { %191 = sbr.rel (%p188_p2) target bundleno = 920 (0x398), region = 40  ;;  %1152 = vmatprep.subr.bf16.mxu0 (!%p188_p2), %v1312_v1  ;;  %1164 = vmatprep.subr.bf16.mxu1 (!%p188_p2), %v1312_v1  ;;  %v1271_v2 = vld [vmem:[%s1555_s1] sm:$0xff] (!%p188_p2)   ;;  %v1273_v4 = vld [vmem:[%s1555_s1 + $0x8] sm:$0xff] (!%p188_p2)   ;;  %v1275_v6 = vld [vmem:[%s1555_s1 + $0x10] sm:$0xff] (!%p188_p2)   ;;  %vm279_vm1 = vcmask (!%p188_p2), 523264   ;;  %vm496_vm4 = vcmask (!%p188_p2), 1046528  }
   0x7   : > { %1153 = vmatpush3.bf16.msra.mxu0 (!%p188_p2), %v1270_v0  ;;  %1160 = vmatprep.mubr.msk.bf16.mxu0 (!%p188_p2), %vm1313_vm0, %v1312_v1  ;;  %v1276_v8 = vld [vmem:[%s1555_s1 + $0x38] sm:$0xff] (!%p188_p2)   ;;  %v1279_v13 = vld [vmem:[%s1555_s1 + $0x40] sm:$0xff] (!%p188_p2)   ;;  %v1280_v15 = vld [vmem:[%s1555_s1 + $0x48] sm:$0xff] (!%p188_p2)   ;;  %v486_v30 = vshrl.u32 (!%p188_p2), %v483_v29, 7  ;;  %v1428_v36 = vand.u32 (!%p188_p2), 127, %v483_v29  ;;  %vm492_vm5 = vcmask (!%p188_p2), 113664  }
   0x8   : > { %1165 = vmatpush3.bf16.msra.mxu1 (!%p188_p2), %v1271_v2  ;;  %1154 = vmatprep.subr.bf16.mxu0 (!%p188_p2), %v1312_v1  ;;  %v1277_v11 = vld [vmem:[%s1555_s1 + $0x18] sm:$0xff] (!%p188_p2)   ;;  %v1281_v16 = vld [vmem:[%s1555_s1 + $0x50] sm:$0xff] (!%p188_p2)   ;;  %v1044_v33 = vld [vmem:[%s1556_s2] ss:$0 sm:$0xff] (!%p188_p2)  ;;  %vm661_vm6 = vcmask (!%p188_p2), 916480   ;;  %vm949_vm8 = vcmask (!%p188_p2), 783360  }
   0x9   : > { %1166 = vmatprep.subr.bf16.mxu1 (!%p188_p2), %v1312_v1  ;;  %1172 = vmatprep.mubr.msk.bf16.mxu1 (!%p188_p2), %vm1313_vm0, %v1312_v1  ;;  %v1282_v17 = vld [vmem:[%s1555_s1 + $0x58] sm:$0xff] (!%p188_p2)   ;;  %v1423_v31 = vmul.u32 (!%p188_p2), 2, %v486_v30  ;;  %v1285_v52 = vld [vmem:[%s1557_s3] sm:$0xff] (!%p188_p2)   ;;  %v1287_v54 = vld [vmem:[%s1557_s3 + $0x8] sm:$0xff] (!%p188_p2)  }
   0xa   : > { %v1283_v51 = vld [vmem:[%s1557_s3 + $0x38] sm:$0xff] (!%p188_p2)   ;;  %v1284_v53 = vld [vmem:[%s1557_s3 + $0x40] sm:$0xff] (!%p188_p2)   ;;  %v1286_v55 = vld [vmem:[%s1557_s3 + $0x48] sm:$0xff] (!%p188_p2)  }
   0xb   : > { %1155 = vmatpush3.bf16.msra.mxu0 (!%p188_p2), %v1272_v3  ;;  %v555_v37 = vadd.s32 (!%p188_p2), 1, %v1423_v31  ;;  %vm488_vm3 = vcmp.eq.s32.totalorder (!%p188_p2), %v1428_v36, %v1423_v31  ;;  %v1289_v56 = vld [vmem:[%s1557_s3 + $0x10] sm:$0xff] (!%p188_p2)   ;;  %v1291_v58 = vld [vmem:[%s1557_s3 + $0x18] sm:$0xff] (!%p188_p2)   ;;  %v1293_v60 = vld [vmem:[%s1557_s3 + $0x20] sm:$0xff] (!%p188_p2)   ;;  %v790_v2 = vadd.s32 (!%p188_p2), 2, %v1423_v31 }
   0xc   : > { %1167 = vmatpush3.bf16.msra.mxu1 (!%p188_p2), %v1273_v4  ;;  %1156 = vmatprep.subr.bf16.mxu0 (!%p188_p2), %v1312_v1  ;;  %v1045_v46 = vsel (!%p188_p2), %vm488_vm3, 1.0, %v1312_v1  ;;  %v1288_v57 = vld [vmem:[%s1557_s3 + $0x50] sm:$0xff] (!%p188_p2)   ;;  %v1290_v59 = vld [vmem:[%s1557_s3 + $0x58] sm:$0xff] (!%p188_p2)   ;;  %v1292_v61 = vld [vmem:[%s1557_s3 + $0x60] sm:$0xff] (!%p188_p2)  }
   0xd   : > { %s1561_s19 = smov (!%p214_p3, %s1004_s19), 1  ;;  %1168 = vmatprep.subr.bf16.mxu1 %v1312_v1  ;;  %vm556_vm2 = vcmp.eq.s32.totalorder %v1428_v36, %v555_v37  ;;  %v491_v50 = vpack.c.bf16 %v1045_v46, %v1045_v46  ;;  %v1294_v62 = vld [vmem:[%s1557_s3 + $0x68] sm:$0xff]   ;;  %v1296_v0 = vld [vmem:[%s1557_s3 + $0x30] sm:$0xff]   ;;  %vm791_vm7 = vcmp.eq.s32.totalorder %v1428_v36, %v790_v2  ;;  %v1103_v36 = vld [vmem:[%s1558_s4] ss:$0 sm:$0xff] }
   0xe   : > { %s1106_s30 = sshll.u32 %s1561_s19, 3  ;;  %v1047_v45 = vsel %vm556_vm2, 1.0, %v1312_v1  ;;  %v1295_v63 = vld [vmem:[%s1557_s3 + $0x28] sm:$0xff]  }
   0xf   : > { %s218_s10 = scalar_lea.vmem %s1554_s0, %s1106_s30  ;;  %1157 = vmatpush3.bf16.msra.mxu0 %v1274_v5  ;;  %v559_v49 = vpack.c.bf16 %v1047_v45, %v1047_v45  ;;  %s222_s29 = scalar_lea.vmem %s1559_s5, %s1106_s30 }
  0x10   : > { %v1278_v7 = vld [vmem:[%s218_s10] sm:$0xff]   ;;  %1169 = vmatpush3.bf16.msra.mxu1 %v1275_v6  ;;  %1158 = vmatprep.subr.bf16.mxu0 %v1312_v1 }
  0x11   : > { %v249_v9 = vshrl.u32 %v1278_v7, 16  ;;  %v251_v10 = vshll.u32 %v1278_v7, 16  ;;  %1170 = vmatprep.subr.bf16.mxu1 %v1312_v1  ;;  %v400_v18 = vrot.slane %v1278_v7, 1 }
  0x13   : > { %v253_v12 = vrot.slane %v251_v10, 1  ;;  %1159 = vmatpush3.bf16.msra.mxu0 %v1276_v8 }
  0x14   : > { %1171 = vmatpush3.bf16.msra.mxu1 %v1277_v11  ;;  %1176 = vmatprep.subr.bf16.mxu0 %v1312_v1 }
  0x15   : > { %v254_v14 = vor.u32 %v253_v12, %v249_v9  ;;  %1194 = vmatprep.subr.bf16.mxu1 %v1312_v1  ;;  %v1297_v9 = vld [vmem:[%s1557_s3 + $0x70] sm:$0xff]  }
  0x17   : > { %1161 = vmatmul.mubr.msk.bf16.vlgmr.msra.gmra.mrb[0].mxu0 %vm279_vm1, %v254_v14  ;;  %1173 = vmatmul.mubr.msk.bf16.vlgmr.msra.gmra.mrb[0].mxu1 %vm279_vm1, %v1278_v7  ;;  %v1079_v14 = vsel %vm791_vm7, 1.0, %v1312_v1 }
  0x18   : > { %1177 = vmatpush3.bf16.msra.mxu0 %v1279_v13  ;;  %1184 = vmatprep.mubr.msk.bf16.mxu0 %vm1313_vm0, %v1312_v1 }
  0x19   : > { %1178 = vmatprep.subr.bf16.mxu0 %v1312_v1  ;;  %1196 = vmatprep.mubr.msk.bf16.mxu1 %vm1313_vm0, %v1312_v1 }
  0x1c   : > { %1179 = vmatpush3.bf16.msra.mxu0 %v1280_v15  ;;  %v1298_v15 = vld [vmem:[%s1557_s3 + $0x78] sm:$0xff]  }
  0x1d   : > { %1180 = vmatprep.subr.bf16.mxu0 %v1312_v1 }
  0x20   : > { %1181 = vmatpush3.bf16.msra.mxu0 %v1281_v16  ;;  %v794_v16 = vpack.c.bf16 %v1079_v14, %v1079_v14 }
  0x21   : > { %1182 = vmatprep.subr.bf16.mxu0 %v1312_v1 }
  0x24   : > { %1183 = vmatpush3.bf16.msra.mxu0 %v1282_v17  ;;  %v1299_v17 = vld [vmem:[%s1557_s3 + $0x80] sm:$0xff]  }
  0x25   : > { %1188 = vmatprep.subr.bf16.mxu0 %v1312_v1 }
  0x27   : > { %1185 = vmatmul.mubr.msk.bf16.vlgmr.msra.gmra.mrb[4].mxu0 %vm279_vm1, %v400_v18  ;;  %v1300_v18 = vld [vmem:[%s1557_s3 + $0x88] sm:$0xff]  }
  0x28   : > { %1190 = vmatprep.mubr.msk.bf16.mxu0 %vm1313_vm0, %v1312_v1 }
  0xea   : > { %v317_v19 = vpop.f32.mrb[0].mxu0  ;;  %v384_v20 = vpop.f32.mrb[0].mxu1 }
  0xeb   : > { %v1162_v21 = vpop.f32.mrb[1].mxu0  ;;  %v385_v22 = vadd.f32 %v384_v20, %v317_v19  ;;  %v1174_v23 = vpop.f32.mrb[1].mxu1  ;;  %v1301_v19 = vld [vmem:[%s1557_s3 + $0x90] sm:$0xff]   ;;  %v1302_v20 = vld [vmem:[%s1557_s3 + $0x98] sm:$0xff]  }
  0xec   : > { %v320_v24 = vpop.f32.mrb[2].mxu0  ;;  %v387_v25 = vpop.f32.mrb[2].mxu1  ;;  %v1303_v21 = vld [vmem:[%s1557_s3 + $0xa0] sm:$0xff]  }
  0xed   : > { %v1163_v26 = vpop.f32.mrb[3].mxu0  ;;  %v388_v27 = vadd.f32 %v387_v25, %v320_v24  ;;  %v1175_v28 = vpop.f32.mrb[3].mxu1 }
  0xfa   : > { %v462_v32 = vpop.f32.mrb[4].mxu0 }
  0xfb   : > { %v469_v34 = vadd.f32 %v462_v32, %v385_v22  ;;  %v1186_v35 = vpop.f32.mrb[5].mxu0 }
  0xfc   : > { %v465_v38 = vpop.f32.mrb[6].mxu0 }
  0xfd   : > { %v478_v39 = vadd.f32 %v1044_v33, %v469_v34  ;;  %v470_v40 = vadd.f32 %v465_v38, %v388_v27  ;;  %v1187_v41 = vpop.f32.mrb[7].mxu0 }
  0xff   : > { %v479_v42 = vadd.f32 %v1044_v33, %v470_v40  ;;  %v480_v43 = vmax.f32 %v478_v39, 0.0 }
 0x101   : > { %v481_v44 = vmax.f32 %v479_v42, 0.0 }
 0x103   : > { %v482_v47 = vpack.c.bf16 %v481_v44, %v480_v43 }
 0x105   : > { %v1436_v48 = vsel %vm496_vm4, %v482_v47, 0 }
 0x106   : > { %1189 = vmatpush3.bf16.msra.mxu0 %v1436_v48  ;;  %1195 = vmatpush3.bf16.msra.mxu1 %v1436_v48 }
 0x107   : > { %1200 = vmatprep.subr.bf16.mxu0 %v1312_v1  ;;  %1218 = vmatprep.subr.bf16.mxu1 %v1312_v1 }
 0x109   : > { %1197 = vmatmul.mubr.msk.bf16.vlgmr.msra.gmra.mrb[4].mxu1 %vm492_vm5, %v559_v49  ;;  %1191 = vmatmul.mubr.msk.bf16.vlgmr.msra.gmra.mrb[8].mxu0 %vm492_vm5, %v491_v50 }
 0x10a   : > { %1201 = vmatpush3.bf16.msra.mxu0 %v1283_v51  ;;  %1219 = vmatpush3.bf16.msra.mxu1 %v1285_v52 }
 0x10b   : > { %1202 = vmatprep.subr.bf16.mxu0 %v1312_v1  ;;  %1220 = vmatprep.subr.bf16.mxu1 %v1312_v1 }
 0x10c   : > { %1214 = vmatprep.mubr.msk.bf16.mxu0 %vm1313_vm0, %v1312_v1  ;;  %1232 = vmatprep.mubr.msk.bf16.mxu1 %vm1313_vm0, %v1312_v1 }
 0x10e   : > { %1203 = vmatpush3.bf16.msra.mxu0 %v1284_v53  ;;  %1221 = vmatpush3.bf16.msra.mxu1 %v1287_v54 }
 0x10f   : > { %1204 = vmatprep.subr.bf16.mxu0 %v1312_v1  ;;  %1222 = vmatprep.subr.bf16.mxu1 %v1312_v1 }
 0x112   : > { %1205 = vmatpush3.bf16.msra.mxu0 %v1286_v55  ;;  %1223 = vmatpush3.bf16.msra.mxu1 %v1289_v56 }
 0x113   : > { %1206 = vmatprep.subr.bf16.mxu0 %v1312_v1  ;;  %1224 = vmatprep.subr.bf16.mxu1 %v1312_v1 }
 0x116   : > { %1207 = vmatpush3.bf16.msra.mxu0 %v1288_v57  ;;  %1225 = vmatpush3.bf16.msra.mxu1 %v1291_v58 }
 0x117   : > { %1208 = vmatprep.subr.bf16.mxu0 %v1312_v1  ;;  %1226 = vmatprep.subr.bf16.mxu1 %v1312_v1 }
 0x11a   : > { %1209 = vmatpush3.bf16.msra.mxu0 %v1290_v59  ;;  %1227 = vmatpush3.bf16.msra.mxu1 %v1293_v60 }
 0x11b   : > { %1210 = vmatprep.subr.bf16.mxu0 %v1312_v1  ;;  %1228 = vmatprep.subr.bf16.mxu1 %v1312_v1 }
 0x11e   : > { %1211 = vmatpush3.bf16.msra.mxu0 %v1292_v61  ;;  %1229 = vmatpush3.bf16.msra.mxu1 %v1295_v63 }
 0x11f   : > { %1212 = vmatprep.subr.bf16.mxu0 %v1312_v1  ;;  %1230 = vmatprep.subr.bf16.mxu1 %v1312_v1 }
 0x122   : > { %1213 = vmatpush3.bf16.msra.mxu0 %v1294_v62  ;;  %1231 = vmatpush3.bf16.msra.mxu1 %v1296_v0 }
 0x123   : > { %1236 = vmatprep.subr.bf16.mxu0 %v1312_v1  ;;  %1242 = vmatprep.subr.bf16.mxu1 %v1312_v1 }
 0x1dc   : > { %v597_v3 = vpop.f32.mrb[4].mxu1  ;;  %v534_v4 = vpop.f32.mrb[8].mxu0 }
 0x1dd   : > { %v603_v5 = vpack.c.bf16 %v597_v3, %v597_v3  ;;  %v1198_v6 = vpop.f32.mrb[5].mxu1  ;;  %v540_v7 = vpack.c.bf16 %v534_v4, %v534_v4  ;;  %v1192_v8 = vpop.f32.mrb[9].mxu0 }
 0x1de   : > { %v600_v10 = vpop.f32.mrb[6].mxu1  ;;  %v537_v11 = vpop.f32.mrb[10].mxu0 }
 0x1df   : > { %1215 = vmatmul.mubr.msk.bf16.vlgmr.msra.gmra.mrb[12].mxu0 %vm661_vm6, %v603_v5  ;;  %v1199_v12 = vpop.f32.mrb[7].mxu1  ;;  %1233 = vmatmul.mubr.msk.bf16.vlgmr.msra.gmra.mrb[8].mxu1 %vm661_vm6, %v540_v7  ;;  %v1193_v13 = vpop.f32.mrb[11].mxu0 }
 0x1e0   : > { %1237 = vmatpush3.bf16.msra.mxu0 %v1436_v48  ;;  %1238 = vmatprep.mubr.msk.bf16.mxu0 %vm1313_vm0, %v1312_v1 }
 0x1e1   : > { %1243 = vmatpush3.bf16.msra.mxu1 %v1297_v9  ;;  %1256 = vmatprep.mubr.msk.bf16.mxu1 %vm1313_vm0, %v1312_v1 }
 0x1e2   : > { %1244 = vmatprep.subr.bf16.mxu1 %v1312_v1 }
 0x1e5   : > { %1245 = vmatpush3.bf16.msra.mxu1 %v1298_v15 }
 0x1e6   : > { %1246 = vmatprep.subr.bf16.mxu1 %v1312_v1 }
 0x1e7   : > { %1239 = vmatmul.mubr.msk.bf16.vlgmr.msra.gmra.mrb[16].mxu0 %vm492_vm5, %v794_v16 }
 0x1e9   : > { %1247 = vmatpush3.bf16.msra.mxu1 %v1299_v17 }
 0x1ea   : > { %1248 = vmatprep.subr.bf16.mxu1 %v1312_v1 }
 0x1ed   : > { %1249 = vmatpush3.bf16.msra.mxu1 %v1300_v18 }
 0x1ee   : > { %1250 = vmatprep.subr.bf16.mxu1 %v1312_v1 }
 0x1f1   : > { %1251 = vmatpush3.bf16.msra.mxu1 %v1301_v19 }
 0x1f2   : > { %1252 = vmatprep.subr.bf16.mxu1 %v1312_v1 }
 0x1f5   : > { %1253 = vmatpush3.bf16.msra.mxu1 %v1302_v20 }
 0x1f6   : > { %1254 = vmatprep.subr.bf16.mxu1 %v1312_v1 }
 0x1f9   : > { %1255 = vmatpush3.bf16.msra.mxu1 %v1303_v21 }
 0x2b2   : > { %v699_v22 = vpop.f32.mrb[12].mxu0  ;;  %v784_v23 = vpop.f32.mrb[8].mxu1 }
 0x2b3   : > { %v1216_v24 = vpop.f32.mrb[13].mxu0  ;;  %v785_v25 = vadd.f32 %v784_v23, %v699_v22  ;;  %v1234_v26 = vpop.f32.mrb[9].mxu1 }
 0x2b4   : > { %v702_v27 = vpop.f32.mrb[14].mxu0  ;;  %v787_v28 = vpop.f32.mrb[10].mxu1 }
 0x2b5   : > { %v1217_v29 = vpop.f32.mrb[15].mxu0  ;;  %v1235_v30 = vpop.f32.mrb[11].mxu1 }
 0x2ba   : > { %v832_v31 = vpop.f32.mrb[16].mxu0 }
 0x2bb   : > { %v838_v32 = vpack.c.bf16 %v832_v31, %v832_v31  ;;  %v1240_v33 = vpop.f32.mrb[17].mxu0 }
 0x2bc   : > { %v835_v34 = vpop.f32.mrb[18].mxu0 }
 0x2bd   : > { %1257 = vmatmul.mubr.msk.bf16.vlgmr.msra.gmra.mrb[12].mxu1 %vm661_vm6, %v838_v32  ;;  %v1241_v1 = vpop.f32.mrb[19].mxu0 }
 0x390   : > { %v933_v35 = vpop.f32.mrb[12].mxu1 }
 0x391   : > { %v939_v37 = vadd.f32 %v933_v35, %v785_v25  ;;  %v1258_v38 = vpop.f32.mrb[13].mxu1 }
 0x392   : > { %v936_v39 = vpop.f32.mrb[14].mxu1 }
 0x393   : > { %v947_v40 = vadd.f32 %v1103_v36, %v939_v37  ;;  %v1259_v41 = vpop.f32.mrb[15].mxu1 }
 0x395   : > { %v948_v42 = vmax.f32 %v947_v40, 0.0 }
 0x397   : > { %950 = vst.msk [vmem:[%s222_s29] sm:$0x3f] %vm949_vm8, %v948_v42 }
 0x398 PF: > { %s15_s18 = sadd.s32 1, %s1310_s18  }
 0x399   : > { %p12_p4 = scmp.ge.s32.totalorder %s15_s18, 4  }
 0x39b   :  { %14 = sbr.rel (!%p12_p4) target bundleno = 1 (0x1), region = 74 }

</bundles_post_ra>
